<compile_context>
chip_gen: v7x
topology: tpu7x:2x2x1
jax: 0.10.0
libtpu: 0.0.40
codegen_flags: <defaults>
</compile_context>

<pallas_src>
import functools

import jax
import jax.numpy as jnp
from jax.experimental import pallas as pl
from jax.experimental.pallas import tpu as pltpu

KERNEL_SIZE = 7
PAD = KERNEL_SIZE // 2


def _build_toeplitz(weight, W):
    """Banded conv matrices, one per kernel row ki.

    T[ki] has shape (LW, W) with LW = 2*(W+2P) rounded up to a 128-lane tile:
      T[ki][c*Wp + w + kj, w] = weight[0, c, ki, kj]
    Rows >= 2*Wp (and every non-band entry) are zero, so a matmul of a padded
    scratch row block against T[ki] performs the kj-sum and channel-sum of the
    PyTorch cross-correlation exactly.
    """
    K = weight.shape[-1]
    P = K // 2
    Wp = W + 2 * P
    LW = ((2 * Wp + 127) // 128) * 128
    wt = weight.reshape(2, K, K).astype(jnp.float32)          # (c, ki, kj)
    p = jnp.arange(Wp)[:, None]                                # padded col index
    w = jnp.arange(W)[None, :]                                 # output col index
    kj = p - w                                                 # (Wp, W)
    valid = (kj >= 0) & (kj < K)
    band = jnp.where(valid[None, None],
                     jnp.take(wt, jnp.clip(kj, 0, K - 1), axis=2),
                     0.0)                                      # (2, K, Wp, W)
    T = jnp.transpose(band, (1, 0, 2, 3)).reshape(K, 2 * Wp, W)
    T = jnp.pad(T, ((0, 0), (0, LW - 2 * Wp), (0, 0)))
    return T                                                   # (K, LW, W) f32


def spatial_attention_kernel(bias_ref, x_ref, t_ref, o_ref, pad_ref, *, G, H, W):
    # bias_ref: (1,)            SMEM (scalar prefetch)  -- conv bias
    # x_ref:    (G, C, H, W)    VMEM  -- one batch group
    # t_ref:    (K, LW, W)      VMEM  -- banded conv weights (fetched once)
    # o_ref:    (G, H, W)       VMEM  -- output (channel dim squeezed)
    # pad_ref:  (G, H+2P, LW)   VMEM scratch -- zero-padded max|avg maps
    K = KERNEL_SIZE
    P = PAD
    Wp = W + 2 * P
    LW = pad_ref.shape[-1]

    # Zero the padded scratch every step (few KiB of vst).  Unconditional (not
    # keyed on program_id==0) so the batch axis can be "parallel"/core-sharded
    # on v7x without any cross-step scratch dependence.
    pad_ref[...] = jnp.zeros_like(pad_ref)

    # Channel reduction over the major (non-tiled) axis: pure VPU elementwise.
    # Single load of x; max in native dtype, mean accumulated in f32.
    x = x_ref[...]                                            # (G, C, H, W)
    max_map = jnp.max(x, axis=1).astype(jnp.float32)          # (G, H, W)
    avg_map = jnp.mean(x.astype(jnp.float32), axis=1)         # (G, H, W)

    # Interior writes: channel 0 (max) occupies lanes [P, P+W), channel 1 (avg)
    # lanes [Wp+P, Wp+P+W).  Halo lanes/rows (and lanes >= 2*Wp) stay zero so
    # the full-LW MXU contraction below is exact.
    pad_ref[pl.ds(0, G), pl.ds(P, H), pl.ds(P, W)] = max_map
    pad_ref[pl.ds(0, G), pl.ds(P, H), pl.ds(Wp + P, W)] = avg_map

    # 7x7 conv on the MXU: one sublane-shifted load + one matmul per kernel
    # row ki (channels concatenated along the contraction), accumulated in f32.
    acc = None
    for ki in range(K):
        lhs = pad_ref[pl.ds(0, G), pl.ds(ki, H), pl.ds(0, LW)]   # (G, H, LW)
        lhs = lhs.reshape(G * H, LW)
        term = jnp.dot(lhs, t_ref[ki], preferred_element_type=jnp.float32)
        acc = term if acc is None else acc + term                # (G*H, W)

    acc = acc + bias_ref[0]
    o_ref[...] = jax.nn.sigmoid(acc).reshape(G, H, W).astype(o_ref.dtype)


def spatial_attention(x, weight, bias, *, batch_group=None):
    """x: (B, C, H, W); weight: (1, 2, K, K); bias: (1,) -> (B, 1, H, W)."""
    B, C, H, W = x.shape
    K = KERNEL_SIZE
    P = PAD
    Wp = W + 2 * P
    LW = ((2 * Wp + 127) // 128) * 128

    if batch_group is None:
        # Keep the grid length at 2 when possible: both v7x TensorCores get
        # work under the "parallel" batch axis, while per-step overhead
        # (~0.35 us) is amortized over B/2 batch elements on single-TC chips.
        batch_group = B // 2 if (B % 2 == 0 and B >= 2) else 1
    G = batch_group
    assert B % G == 0, "batch_group must divide the batch"
    num_steps = B // G

    T = _build_toeplitz(weight, W)                       # (K, LW, W) f32
    b = bias.reshape(1).astype(jnp.float32)              # scalar-prefetch arg

    kernel = functools.partial(spatial_attention_kernel, G=G, H=H, W=W)

    out = pl.pallas_call(
        kernel,
        out_shape=jax.ShapeDtypeStruct((B, 1, H, W), x.dtype),
        grid_spec=pltpu.PrefetchScalarGridSpec(
            num_scalar_prefetch=1,                       # bias -> SMEM, once
            grid=(num_steps,),
            in_specs=[
                pl.BlockSpec((G, C, H, W), lambda i, b_ref: (i, 0, 0, 0)),
                # Constant block index -> weights fetched once, stay resident.
                pl.BlockSpec((K, LW, W), lambda i, b_ref: (0, 0, 0)),
            ],
            out_specs=pl.BlockSpec((G, None, H, W),
                                   lambda i, b_ref: (i, 0, 0, 0)),
            scratch_shapes=[
                pltpu.VMEM((G, H + 2 * P, LW), jnp.float32),
            ],
        ),
        # Batch groups are independent work -> "parallel" (sharded across the
        # two TensorCores on v7x; measured-neutral on single-TC v5e/v6e).
        compiler_params=pltpu.CompilerParams(
            dimension_semantics=("parallel",)),
    )(b, x, T)
    return out


def spatial_attention_ref(x, weight, bias):
    """Pure-JAX reference matching the PyTorch module."""
    max_map = jnp.max(x, axis=1, keepdims=True)
    avg_map = jnp.mean(x, axis=1, keepdims=True)
    stacked = jnp.concatenate([max_map, avg_map], axis=1)  # (B, 2, H, W)
    out = jax.lax.conv_general_dilated(
        stacked, weight,
        window_strides=(1, 1),
        padding=((PAD, PAD), (PAD, PAD)),
        dimension_numbers=("NCHW", "OIHW", "NCHW"),
        precision=jax.lax.Precision.HIGHEST,
    ) + bias.reshape(1, 1, 1, 1)
    return jax.nn.sigmoid(out)


if __name__ == "__main__":
    key = jax.random.PRNGKey(0)
    k_x, k_w, k_b = jax.random.split(key, 3)

    B, C, H, W = 2, 4, 16, 16
    x = jax.random.normal(k_x, (B, C, H, W), dtype=jnp.float32)

    # Deterministic Conv2d(2, 1, 7, padding=3) params (kaiming-uniform-like bound).
    fan_in = 2 * KERNEL_SIZE * KERNEL_SIZE
    bound = 1.0 / (fan_in ** 0.5)
    weight = jax.random.uniform(k_w, (1, 2, KERNEL_SIZE, KERNEL_SIZE),
                                minval=-bound, maxval=bound, dtype=jnp.float32)
    bias = jax.random.uniform(k_b, (1,), minval=-bound, maxval=bound,
                              dtype=jnp.float32)

    out = spatial_attention(x, weight, bias)
    jax.block_until_ready(out)

    ref = spatial_attention_ref(x, weight, bias)
    assert out.shape == (B, 1, H, W)
    # Tolerance leaves margin for the MXU f32 pass decomposition vs. the XLA
    # conv reference; real indexing/semantic bugs are O(1e-1) here.
    err = float(jnp.max(jnp.abs(out - ref)))
    assert jnp.allclose(out, ref, atol=1e-4, rtol=1e-4), f"max abs err {err}"

    print("KERNEL_OK")
</pallas_src>

<mosaic_0001>
module attributes {stable_mosaic.version = 11 : i64} {
  func.func @spatial_attention_kernel(%arg0: i32, %arg1: memref<1xf32, #tpu.memory_space<smem>>, %arg2: memref<1x4x16x16xf32, #tpu.memory_space<vmem>>, %arg3: memref<7x128x16xf32, #tpu.memory_space<vmem>>, %arg4: memref<1x1x16x16xf32, #tpu.memory_space<vmem>>, %arg5: memref<1x22x128xf32, #tpu.memory_space<vmem>>) attributes {dimension_semantics = [#tpu.dimension_semantics<parallel>], iteration_bounds = array<i64: 2>, scalar_prefetch = 1 : i64, scratch_operands = 1 : i64, tpu.core_type = #tpu.core_type<tc>, window_params = [{transform_indices = @transform_0, window_bounds = array<i64: 1, 4, 16, 16>}, {pipeline_mode = #tpu.pipeline_mode<synchronous>, transform_indices = @transform_1, window_bounds = array<i64: 7, 128, 16>}, {transform_indices = @transform_2, window_bounds = array<i64: 1, 1, 16, 16>}]} {
    %cst = arith.constant 0.000000e+00 : f32
    %0 = vector.broadcast %cst : f32 to vector<1x22x128xf32>
    %c0 = arith.constant 0 : index
    %c0_0 = arith.constant 0 : index
    %c0_1 = arith.constant 0 : index
    %1 = vector.load %arg5[%c0, %c0_0, %c0_1] : memref<1x22x128xf32, #tpu.memory_space<vmem>>, vector<1x22x128xf32>
    tpu.vector_store %arg5[%c0, %c0_0, %c0_1], %0 {strides = array<i32>} : memref<1x22x128xf32, #tpu.memory_space<vmem>>, vector<1x22x128xf32>,
    %c0_2 = arith.constant 0 : index
    %c0_3 = arith.constant 0 : index
    %c0_4 = arith.constant 0 : index
    %c0_5 = arith.constant 0 : index
    %2 = vector.load %arg2[%c0_2, %c0_3, %c0_4, %c0_5] : memref<1x4x16x16xf32, #tpu.memory_space<vmem>>, vector<1x4x16x16xf32>
    %cst_6 = arith.constant dense<0xFF800000> : vector<1x16x16xf32>
    %3 = vector.multi_reduction <maximumf>, %2, %cst_6 [1] : vector<1x4x16x16xf32> to vector<1x16x16xf32>
    %cst_7 = arith.constant dense<0.000000e+00> : vector<1x16x16xf32>
    %4 = vector.multi_reduction <add>, %2, %cst_7 [1] : vector<1x4x16x16xf32> to vector<1x16x16xf32>
    %cst_8 = arith.constant 4.000000e+00 : f32
    %5 = vector.broadcast %cst_8 : f32 to vector<1x16x16xf32>
    %6 = arith.divf %4, %5 : vector<1x16x16xf32>
    %c0_9 = arith.constant 0 : index
    %c3 = arith.constant 3 : index
    %c3_10 = arith.constant 3 : index
    %7 = vector.load %arg5[%c0_9, %c3, %c3_10] : memref<1x22x128xf32, #tpu.memory_space<vmem>>, vector<1x16x16xf32>
    tpu.vector_store %arg5[%c0_9, %c3, %c3_10], %3 {strides = array<i32>} : memref<1x22x128xf32, #tpu.memory_space<vmem>>, vector<1x16x16xf32>,
    %c0_11 = arith.constant 0 : index
    %c3_12 = arith.constant 3 : index
    %c25 = arith.constant 25 : index
    %8 = vector.load %arg5[%c0_11, %c3_12, %c25] : memref<1x22x128xf32, #tpu.memory_space<vmem>>, vector<1x16x16xf32>
    tpu.vector_store %arg5[%c0_11, %c3_12, %c25], %6 {strides = array<i32>} : memref<1x22x128xf32, #tpu.memory_space<vmem>>, vector<1x16x16xf32>,
    %c0_13 = arith.constant 0 : index
    %c0_14 = arith.constant 0 : index
    %c0_15 = arith.constant 0 : index
    %9 = vector.load %arg5[%c0_13, %c0_14, %c0_15] : memref<1x22x128xf32, #tpu.memory_space<vmem>>, vector<1x16x128xf32>
    %10 = vector.shape_cast %9 : vector<1x16x128xf32> to vector<16x128xf32>
    %c0_16 = arith.constant 0 : index
    %c0_17 = arith.constant 0 : index
    %c0_18 = arith.constant 0 : index
    %11 = vector.load %arg3[%c0_16, %c0_17, %c0_18] : memref<7x128x16xf32, #tpu.memory_space<vmem>>, vector<1x128x16xf32>
    %12 = vector.shape_cast %11 : vector<1x128x16xf32> to vector<128x16xf32>
    %cst_19 = arith.constant dense<0.000000e+00> : vector<16x16xf32>
    %13 = tpu.matmul %10, %12, %cst_19 {dimension_numbers = #tpu.dot_dimension_numbers<[1], [0], [0], [1], [0, 0, 1, 1], [], []>} : vector<16x128xf32>, vector<128x16xf32>, vector<16x16xf32> -> vector<16x16xf32>
    %c0_20 = arith.constant 0 : index
    %c1 = arith.constant 1 : index
    %c0_21 = arith.constant 0 : index
    %14 = vector.load %arg5[%c0_20, %c1, %c0_21] : memref<1x22x128xf32, #tpu.memory_space<vmem>>, vector<1x16x128xf32>
    %15 = vector.shape_cast %14 : vector<1x16x128xf32> to vector<16x128xf32>
    %c1_22 = arith.constant 1 : index
    %c0_23 = arith.constant 0 : index
    %c0_24 = arith.constant 0 : index
    %16 = vector.load %arg3[%c1_22, %c0_23, %c0_24] : memref<7x128x16xf32, #tpu.memory_space<vmem>>, vector<1x128x16xf32>
    %17 = vector.shape_cast %16 : vector<1x128x16xf32> to vector<128x16xf32>
    %cst_25 = arith.constant dense<0.000000e+00> : vector<16x16xf32>
    %18 = tpu.matmul %15, %17, %cst_25 {dimension_numbers = #tpu.dot_dimension_numbers<[1], [0], [0], [1], [0, 0, 1, 1], [], []>} : vector<16x128xf32>, vector<128x16xf32>, vector<16x16xf32> -> vector<16x16xf32>
    %19 = arith.addf %13, %18 : vector<16x16xf32>
    %c0_26 = arith.constant 0 : index
    %c2 = arith.constant 2 : index
    %c0_27 = arith.constant 0 : index
    %20 = vector.load %arg5[%c0_26, %c2, %c0_27] : memref<1x22x128xf32, #tpu.memory_space<vmem>>, vector<1x16x128xf32>
    %21 = vector.shape_cast %20 : vector<1x16x128xf32> to vector<16x128xf32>
    %c2_28 = arith.constant 2 : index
    %c0_29 = arith.constant 0 : index
    %c0_30 = arith.constant 0 : index
    %22 = vector.load %arg3[%c2_28, %c0_29, %c0_30] : memref<7x128x16xf32, #tpu.memory_space<vmem>>, vector<1x128x16xf32>
    %23 = vector.shape_cast %22 : vector<1x128x16xf32> to vector<128x16xf32>
    %cst_31 = arith.constant dense<0.000000e+00> : vector<16x16xf32>
    %24 = tpu.matmul %21, %23, %cst_31 {dimension_numbers = #tpu.dot_dimension_numbers<[1], [0], [0], [1], [0, 0, 1, 1], [], []>} : vector<16x128xf32>, vector<128x16xf32>, vector<16x16xf32> -> vector<16x16xf32>
    %25 = arith.addf %19, %24 : vector<16x16xf32>
    %c0_32 = arith.constant 0 : index
    %c3_33 = arith.constant 3 : index
    %c0_34 = arith.constant 0 : index
    %26 = vector.load %arg5[%c0_32, %c3_33, %c0_34] : memref<1x22x128xf32, #tpu.memory_space<vmem>>, vector<1x16x128xf32>
    %27 = vector.shape_cast %26 : vector<1x16x128xf32> to vector<16x128xf32>
    %c3_35 = arith.constant 3 : index
    %c0_36 = arith.constant 0 : index
    %c0_37 = arith.constant 0 : index
    %28 = vector.load %arg3[%c3_35, %c0_36, %c0_37] : memref<7x128x16xf32, #tpu.memory_space<vmem>>, vector<1x128x16xf32>
    %29 = vector.shape_cast %28 : vector<1x128x16xf32> to vector<128x16xf32>
    %cst_38 = arith.constant dense<0.000000e+00> : vector<16x16xf32>
    %30 = tpu.matmul %27, %29, %cst_38 {dimension_numbers = #tpu.dot_dimension_numbers<[1], [0], [0], [1], [0, 0, 1, 1], [], []>} : vector<16x128xf32>, vector<128x16xf32>, vector<16x16xf32> -> vector<16x16xf32>
    %31 = arith.addf %25, %30 : vector<16x16xf32>
    %c0_39 = arith.constant 0 : index
    %c4 = arith.constant 4 : index
    %c0_40 = arith.constant 0 : index
    %32 = vector.load %arg5[%c0_39, %c4, %c0_40] : memref<1x22x128xf32, #tpu.memory_space<vmem>>, vector<1x16x128xf32>
    %33 = vector.shape_cast %32 : vector<1x16x128xf32> to vector<16x128xf32>
    %c4_41 = arith.constant 4 : index
    %c0_42 = arith.constant 0 : index
    %c0_43 = arith.constant 0 : index
    %34 = vector.load %arg3[%c4_41, %c0_42, %c0_43] : memref<7x128x16xf32, #tpu.memory_space<vmem>>, vector<1x128x16xf32>
    %35 = vector.shape_cast %34 : vector<1x128x16xf32> to vector<128x16xf32>
    %cst_44 = arith.constant dense<0.000000e+00> : vector<16x16xf32>
    %36 = tpu.matmul %33, %35, %cst_44 {dimension_numbers = #tpu.dot_dimension_numbers<[1], [0], [0], [1], [0, 0, 1, 1], [], []>} : vector<16x128xf32>, vector<128x16xf32>, vector<16x16xf32> -> vector<16x16xf32>
    %37 = arith.addf %31, %36 : vector<16x16xf32>
    %c0_45 = arith.constant 0 : index
    %c5 = arith.constant 5 : index
    %c0_46 = arith.constant 0 : index
    %38 = vector.load %arg5[%c0_45, %c5, %c0_46] : memref<1x22x128xf32, #tpu.memory_space<vmem>>, vector<1x16x128xf32>
    %39 = vector.shape_cast %38 : vector<1x16x128xf32> to vector<16x128xf32>
    %c5_47 = arith.constant 5 : index
    %c0_48 = arith.constant 0 : index
    %c0_49 = arith.constant 0 : index
    %40 = vector.load %arg3[%c5_47, %c0_48, %c0_49] : memref<7x128x16xf32, #tpu.memory_space<vmem>>, vector<1x128x16xf32>
    %41 = vector.shape_cast %40 : vector<1x128x16xf32> to vector<128x16xf32>
    %cst_50 = arith.constant dense<0.000000e+00> : vector<16x16xf32>
    %42 = tpu.matmul %39, %41, %cst_50 {dimension_numbers = #tpu.dot_dimension_numbers<[1], [0], [0], [1], [0, 0, 1, 1], [], []>} : vector<16x128xf32>, vector<128x16xf32>, vector<16x16xf32> -> vector<16x16xf32>
    %43 = arith.addf %37, %42 : vector<16x16xf32>
    %c0_51 = arith.constant 0 : index
    %c6 = arith.constant 6 : index
    %c0_52 = arith.constant 0 : index
    %44 = vector.load %arg5[%c0_51, %c6, %c0_52] : memref<1x22x128xf32, #tpu.memory_space<vmem>>, vector<1x16x128xf32>
    %45 = vector.shape_cast %44 : vector<1x16x128xf32> to vector<16x128xf32>
    %c6_53 = arith.constant 6 : index
    %c0_54 = arith.constant 0 : index
    %c0_55 = arith.constant 0 : index
    %46 = vector.load %arg3[%c6_53, %c0_54, %c0_55] : memref<7x128x16xf32, #tpu.memory_space<vmem>>, vector<1x128x16xf32>
    %47 = vector.shape_cast %46 : vector<1x128x16xf32> to vector<128x16xf32>
    %cst_56 = arith.constant dense<0.000000e+00> : vector<16x16xf32>
    %48 = tpu.matmul %45, %47, %cst_56 {dimension_numbers = #tpu.dot_dimension_numbers<[1], [0], [0], [1], [0, 0, 1, 1], [], []>} : vector<16x128xf32>, vector<128x16xf32>, vector<16x16xf32> -> vector<16x16xf32>
    %49 = arith.addf %43, %48 : vector<16x16xf32>
    %c0_57 = arith.constant 0 : index
    %50 = memref.load %arg1[%c0_57] : memref<1xf32, #tpu.memory_space<smem>>
    %51 = vector.broadcast %50 : f32 to vector<16x16xf32>
    %52 = arith.addf %49, %51 : vector<16x16xf32>
    %53 = arith.negf %52 : vector<16x16xf32>
    %54 = math.exp %53 : vector<16x16xf32>
    %cst_58 = arith.constant 1.000000e+00 : f32
    %55 = vector.broadcast %cst_58 : f32 to vector<16x16xf32>
    %56 = arith.addf %55, %54 : vector<16x16xf32>
    %57 = arith.divf %55, %56 : vector<16x16xf32>
    %58 = vector.shape_cast %57 : vector<16x16xf32> to vector<1x16x16xf32>
    %c0_59 = arith.constant 0 : index
    %c0_60 = arith.constant 0 : index
    %c0_61 = arith.constant 0 : index
    %c0_62 = arith.constant 0 : index
    %59 = vector.load %arg4[%c0_59, %c0_60, %c0_61, %c0_62] : memref<1x1x16x16xf32, #tpu.memory_space<vmem>>, vector<1x1x16x16xf32>
    %60 = vector.shape_cast %59 : vector<1x1x16x16xf32> to vector<1x16x16xf32>
    %61 = vector.shape_cast %58 : vector<1x16x16xf32> to vector<1x1x16x16xf32>
    tpu.vector_store %arg4[%c0_59, %c0_60, %c0_61, %c0_62], %61 {strides = array<i32>} : memref<1x1x16x16xf32, #tpu.memory_space<vmem>>, vector<1x1x16x16xf32>,
    return
  }
  func.func @transform_0(%arg0: i32, %arg1: memref<1xf32, #tpu.memory_space<smem>>) -> (i32, i32, i32, i32) {
    %c0_i32 = arith.constant 0 : i32
    %c0_i32_0 = arith.constant 0 : i32
    %c0_i32_1 = arith.constant 0 : i32
    %c0_i32_2 = arith.constant 0 : i32
    return %arg0, %c0_i32, %c0_i32_0, %c0_i32_1 : i32, i32, i32, i32
  }
  func.func @transform_1(%arg0: i32, %arg1: memref<1xf32, #tpu.memory_space<smem>>) -> (i32, i32, i32) {
    %c0_i32 = arith.constant 0 : i32
    %c0_i32_0 = arith.constant 0 : i32
    %c0_i32_1 = arith.constant 0 : i32
    %c0_i32_2 = arith.constant 0 : i32
    return %c0_i32, %c0_i32_0, %c0_i32_1 : i32, i32, i32
  }
  func.func @transform_2(%arg0: i32, %arg1: memref<1xf32, #tpu.memory_space<smem>>) -> (i32, i32, i32, i32) {
    %c0_i32 = arith.constant 0 : i32
    %c0_i32_0 = arith.constant 0 : i32
    %c0_i32_1 = arith.constant 0 : i32
    %c0_i32_2 = arith.constant 0 : i32
    return %arg0, %c0_i32, %c0_i32_0, %c0_i32_1 : i32, i32, i32, i32
  }
}

</mosaic_0001>

<bundles_post_ra>
// kernel: tpu_custom_call.1
= control target key start
LH: loop header
LB: loop body
LE: loop exit
PB: predicated region body
PF: predicated region fallthrough
CT: control target
= control target key end

     0   :  { %s2291_s0 = inlined_call_operand.<no memory space> [shape: f32[1], index: 0, kind: input, shape index: {}]   ;;  %s2292_s1 = inlined_call_operand.vmem [shape: f32[2,4,16,16], index: 1, kind: input, shape index: {}]   ;;  %s2293_s2 = inlined_call_operand.vmem [shape: f32[7,128,16], index: 2, kind: input, shape index: {}]   ;;  %s2294_s3 = inlined_call_operand.hbm [shape: f32[2,1,16,16], index: 3, kind: output, shape index: {}]  }
   0x1   :  { %8 = sst [smem:[#allocation4]] %s2291_s0 }
   0x2   :  { %9 = vsyncpa [#allocation6], 0 }
   0x3   :  { %11 = vsyncpa [#allocation6 + $0x1], 0  ;;  %s1834_s14 = smov 0   ;;  %s1836_s15 = smov 0  }
   0x4   :  { %s1838_s16 = smov 0   ;;  %s1840_s17 = smov 0  }
   0x5 LB: > { %s1855_s0 = sadd.s32 4294967295, %s1803_s17   ;;  %s970_s18 = sadd.s32 4294967294, %s1803_s17   ;;  %s1803_s17 = sphi %s1840_s17, %s2300_s17   ;;  %s1799_s16 = sphi %s1838_s16, %s2299_s16   ;;  %s1795_s15 = sphi %s1836_s15, %s2298_s15   ;;  %s1791_s14 = sphi %s1834_s14, %s2297_s14  }
   0x6   : > { %s1859_s19 = sadd.s32 1, %s1803_s17   ;;  %s71_s20 = sadd.s32 1, %s1799_s16 }
   0x7   : > { %s68_s21 = ssub.s32 %s1803_s17, %s1859_s19  ;;  %p81_p0 = scmp.ne.s32.totalorder %s1799_s16, %s1795_s15 }
   0x8   : > { %p69_p1 = scmp.eq.s32.totalorder %s68_s21, 0  ;;  %p82_p2 = scmp.eq.s32.totalorder %s1855_s0, 1 }
   0x9   : > { %p87_p3 = scmp.ne.s32.totalorder %s1795_s15, %s1791_s14  ;;  %p88_p4 = scmp.eq.s32.totalorder %s970_s18, 1 }
   0xa   : > { %s1870_s22 = scalar_select %p69_p1, %s1799_s16, %s71_s20  }
   0xb   : > { %p1872_p5 = por %p82_p2, %p81_p0  ;;  %p1876_p6 = por %p88_p4, %p87_p3 }
   0xc   : > { %p973_p7 = scmp.ge.s32.totalorder %s1803_s17, 1  ;;  %p117_p8 = scmp.lt.s32.totalorder %s1803_s17, 3 }
   0xe   : > { %p118_p9 = pnand %p973_p7, %p117_p8 }
   0xf   : > { %p139_p10 = scmp.lt.s32.totalorder (!%p118_p9), %s1855_s0, 1  ;;  %v977_v0 = vld [vmem:[%s2293_s2 + $0x80] sm:$0xff] (!%p118_p9)  ;;  %v978_v1 = vld [vmem:[%s2293_s2 + $0x88] sm:$0xff] (!%p118_p9)  ;;  %v979_v5 = vld [vmem:[%s2293_s2 + $0x90] sm:$0xff] (!%p118_p9)  ;;  %v1805_v12 = vmov (!%p118_p9), 0.0   ;;  %vm155_vm0 = vcmask (!%p118_p9), 130048  }
  0x10   : > { %121 = sbr.rel (%p118_p9) target bundleno = 520 (0x208), region = 28  ;;  %v1009_v2 = vld [vmem:[%s2293_s2 + $0x180] sm:$0xff] (!%p118_p9)  ;;  %v1453_v3 = vpack.c.bf16 (!%p118_p9), %v978_v1, %v977_v0  ;;  %v1010_v4 = vld [vmem:[%s2293_s2 + $0x188] sm:$0xff] (!%p118_p9)  ;;  %v980_v6 = vld [vmem:[%s2293_s2 + $0x98] sm:$0xff] (!%p118_p9)  ;;  %144 = vst [vmem:[#allocation2] sm:$0xff] (!%p118_p9), %v1805_v12  ;;  %s1806_s5 = smov (!%p118_p9), 3  }
  0x11   : > { %v1549_v7 = vpack.c.bf16 (!%p118_p9), %v1010_v4, %v1009_v2  ;;  %v1457_v8 = vpack.c.bf16 (!%p118_p9), %v980_v6, %v979_v5  ;;  %v1011_v9 = vld [vmem:[%s2293_s2 + $0x190] sm:$0xff] (!%p118_p9)  ;;  %v1012_v10 = vld [vmem:[%s2293_s2 + $0x198] sm:$0xff] (!%p118_p9)  ;;  %v981_v11 = vld [vmem:[%s2293_s2 + $0xa0] sm:$0xff] (!%p118_p9)  ;;  %145 = vst [vmem:[#allocation2 + $0x8] sm:$0xff] (!%p118_p9), %v1805_v12  ;;  %vm195_vm1 = vcmask (!%p118_p9), 154648   ;;  %vm206_vm2 = vcmask (!%p118_p9), 335048  }
  0x12   : > { %146 = vst [vmem:[#allocation2 + $0x10] sm:$0x3f] (!%p118_p9), %v1805_v12  ;;  %1454 = vmatprep.subr.bf16.mxu1 (!%p118_p9), %v1453_v3  ;;  %v1553_v13 = vpack.c.bf16 (!%p118_p9), %v1012_v10, %v1011_v9  ;;  %v982_v14 = vld [vmem:[%s2293_s2 + $0xa8] sm:$0xff] (!%p118_p9)  ;;  %v1013_v15 = vld [vmem:[%s2293_s2 + $0x1a0] sm:$0xff] (!%p118_p9)  ;;  %v983_v17 = vld [vmem:[%s2293_s2 + $0xb0] sm:$0xff] (!%p118_p9)  ;;  %s876_s28 = sld [smem:[#allocation4]] (!%p118_p9) }
  0x13   : > { %v1014_v16 = vld [vmem:[%s2293_s2 + $0x1a8] sm:$0xff] (!%p118_p9)  ;;  %1550 = vmatprep.subr.bf16.mxu0 (!%p118_p9), %v1549_v7  ;;  %1456 = vmatpush3.bf16.msra.mxu1 (!%p118_p9), %v1453_v3  ;;  %v984_v18 = vld [vmem:[%s2293_s2 + $0xb8] sm:$0xff] (!%p118_p9)  ;;  %v1015_v19 = vld [vmem:[%s2293_s2 + $0x1b0] sm:$0xff] (!%p118_p9)  ;;  %v1461_v20 = vpack.c.bf16 (!%p118_p9), %v982_v14, %v981_v11  ;;  %s136_s29 = sand.u32 (!%p118_p9), 1, %s1795_s15   ;;  %s1808_s12 = smov (!%p118_p9), [#allocation5]  }
  0x14   : > { %1552 = vmatpush3.bf16.msra.mxu0 (!%p118_p9), %v1549_v7  ;;  %1458 = vmatprep.subr.bf16.mxu1 (!%p118_p9), %v1457_v8  ;;  %v1016_v21 = vld [vmem:[%s2293_s2 + $0x1b8] sm:$0xff] (!%p118_p9)  ;;  %v1557_v25 = vpack.c.bf16 (!%p118_p9), %v1014_v16, %v1013_v15  ;;  %v1465_v26 = vpack.c.bf16 (!%p118_p9), %v984_v18, %v983_v17  ;;  %v985_v53 = vld [vmem:[%s2293_s2 + $0xc0] sm:$0xff] (!%p118_p9)  ;;  %v986_v54 = vld [vmem:[%s2293_s2 + $0xc8] sm:$0xff] (!%p118_p9)  ;;  %s974_s30 = sshll.u32 (!%p118_p9), %s136_s29, 4  ;;  %s2250_s11 = scalar_lea.sflag (!%p118_p9), [#allocation6], %s136_s29 }
  0x15   : > { %1554 = vmatprep.subr.bf16.mxu0 (!%p118_p9), %v1553_v13  ;;  %v1561_v27 = vpack.c.bf16 (!%p118_p9), %v1016_v21, %v1015_v19  ;;  %v1017_v57 = vld [vmem:[%s2293_s2 + $0x1c0] sm:$0xff] (!%p118_p9)  ;;  %v1018_v58 = vld [vmem:[%s2293_s2 + $0x1c8] sm:$0xff] (!%p118_p9)  ;;  %v1469_v63 = vpack.c.bf16 (!%p118_p9), %v986_v54, %v985_v53  ;;  %v987_v0 = vld [vmem:[%s2293_s2 + $0xd0] sm:$0xff] (!%p118_p9)  ;;  %s1745_s13 = sshll.u32 (!%p118_p9), %s1808_s12, 4  ;;  %s1746_s13 = int_to_ptr.vmem [resolvable:$false] %s1745_s13 }
  0x16   : > { %v988_v1 = vld [vmem:[%s2293_s2 + $0xd8] sm:$0xff] (!%p118_p9)  ;;  %v1565_v4 = vpack.c.bf16 (!%p118_p9), %v1018_v58, %v1017_v57  ;;  %v1019_v5 = vld [vmem:[%s2293_s2 + $0x1d0] sm:$0xff] (!%p118_p9)  ;;  %v989_v9 = vld [vmem:[%s2293_s2 + $0xe0] sm:$0xff] (!%p118_p9) }
  0x17   : > { %s140_s10 = scalar_select %p139_p10, %s1855_s0, 1  ;;  %1460 = vmatpush3.bf16.msra.mxu1 %v1457_v8  ;;  %v1020_v6 = vld [vmem:[%s2293_s2 + $0x1d8] sm:$0xff]  ;;  %v1473_v8 = vpack.c.bf16 %v988_v1, %v987_v0  ;;  %v990_v10 = vld [vmem:[%s2293_s2 + $0xe8] sm:$0xff]  ;;  %v991_v16 = vld [vmem:[%s2293_s2 + $0xf0] sm:$0xff] }
  0x18   : > { %1556 = vmatpush3.bf16.msra.mxu0 %v1553_v13  ;;  %1462 = vmatprep.subr.bf16.mxu1 %v1461_v20  ;;  %v1569_v12 = vpack.c.bf16 %v1020_v6, %v1019_v5  ;;  %v1021_v13 = vld [vmem:[%s2293_s2 + $0x1e0] sm:$0xff]  ;;  %v1022_v14 = vld [vmem:[%s2293_s2 + $0x1e8] sm:$0xff]  ;;  %v1477_v15 = vpack.c.bf16 %v990_v10, %v989_v9  ;;  %v992_v17 = vld [vmem:[%s2293_s2 + $0xf8] sm:$0xff] }
  0x19   : > { %s1080_s4 = sshll.u32 %s140_s10, 6  ;;  %1558 = vmatprep.subr.bf16.mxu0 %v1557_v25  ;;  %s1807_s10 = smov 25   ;;  %v1573_v18 = vpack.c.bf16 %v1022_v14, %v1021_v13  ;;  %v1023_v19 = vld [vmem:[%s2293_s2 + $0x1f0] sm:$0xff]  ;;  %v1481_v21 = vpack.c.bf16 %v992_v17, %v991_v16  ;;  %v1032_v54 = vld [vmem:[%s2293_s2 + $0x238] sm:$0xff]  ;;  %v219_v57 = vld [vmem:[%s2293_s2 + $0x40] sm:$0xff] }
  0x1a   : > { %s143_s18 = scalar_lea.vmem %s2292_s1, %s1080_s4  ;;  %v1031_v53 = vld [vmem:[%s2293_s2 + $0x230] sm:$0xff]  ;;  %v220_v58 = vld [vmem:[%s2293_s2 + $0x48] sm:$0xff]  ;;  %v222_v0 = vld [vmem:[%s2293_s2 + $0x58] sm:$0xff]  ;;  %s1081_s4 = sshll.u32 %s1855_s0, 8 }
  0x1b   : > { %v147_v22 = vld [vmem:[%s143_s18] sm:$0xff]  ;;  %v149_v23 = vld [vmem:[%s143_s18 + $0x10] sm:$0xff]  ;;  %v148_v33 = vld [vmem:[%s143_s18 + $0x8] sm:$0xff]  ;;  %1464 = vmatpush3.bf16.msra.mxu1 %v1461_v20  ;;  %s2244_s9 = scalar_lea.hbm %s2294_s3, %s1081_s4 }
  0x1c   : > { %v151_v24 = vld [vmem:[%s143_s18 + $0x20] sm:$0xff]  ;;  %v153_v28 = vld [vmem:[%s143_s18 + $0x30] sm:$0xff]  ;;  %v156_v29 = vsel %vm155_vm0, %v147_v22, -inf  ;;  %v157_v30 = vsel %vm155_vm0, %v149_v23, -inf  ;;  %v170_v32 = vsel %vm155_vm0, %v147_v22, 0.0  ;;  %v171_v36 = vsel %vm155_vm0, %v149_v23, 0.0  ;;  %1560 = vmatpush3.bf16.msra.mxu0 %v1557_v25  ;;  %1466 = vmatprep.subr.bf16.mxu1 %v1465_v26 }
  0x1d   : > { %v158_v31 = vsel %vm155_vm0, %v151_v24, -inf  ;;  %v160_v35 = vsel %vm155_vm0, %v153_v28, -inf  ;;  %v173_v37 = vsel %vm155_vm0, %v151_v24, 0.0  ;;  %v152_v38 = vld [vmem:[%s143_s18 + $0x28] sm:$0xff]  ;;  %v154_v39 = vld [vmem:[%s143_s18 + $0x38] sm:$0xff]  ;;  %v172_v41 = vadd.f32 %v171_v36, %v170_v32  ;;  %1562 = vmatprep.subr.bf16.mxu0 %v1561_v27  ;;  %v211_v22 = vld [vmem:[%s2293_s2] sm:$0xff] }
  0x1e   : > { %v159_v34 = vmax.f32 %v156_v29, %v158_v31  ;;  %v161_v40 = vmax.f32 %v157_v30, %v160_v35  ;;  %v175_v42 = vsel %vm155_vm0, %v153_v28, 0.0  ;;  %v150_v43 = vld [vmem:[%s143_s18 + $0x18] sm:$0xff]  ;;  %v163_v44 = vsel %vm155_vm0, %v148_v33, -inf  ;;  %v212_v23 = vld [vmem:[%s2293_s2 + $0x8] sm:$0xff]  ;;  %v1025_v25 = vld [vmem:[%s2293_s2 + $0x200] sm:$0xff]  ;;  %s1747_s18 = scalar_lea.vmem %s1746_s13, 512 }
  0x1f   : > { %v164_v45 = vsel %vm155_vm0, %v150_v43, -inf  ;;  %v165_v46 = vsel %vm155_vm0, %v152_v38, -inf  ;;  %v167_v47 = vsel %vm155_vm0, %v154_v39, -inf  ;;  %v177_v48 = vsel %vm155_vm0, %v148_v33, 0.0  ;;  %1468 = vmatpush3.bf16.msra.mxu1 %v1465_v26  ;;  %v1024_v20 = vld [vmem:[%s2293_s2 + $0x1f8] sm:$0xff]  ;;  %v1026_v26 = vld [vmem:[%s2293_s2 + $0x208] sm:$0xff] }
  0x20   : > { %v162_v49 = vmax.f32 %v159_v34, %v161_v40  ;;  %v174_v50 = vadd.f32 %v173_v37, %v172_v41  ;;  %v166_v51 = vmax.f32 %v163_v44, %v165_v46  ;;  %v168_v52 = vmax.f32 %v164_v45, %v167_v47  ;;  %1564 = vmatpush3.bf16.msra.mxu0 %v1561_v27  ;;  %v213_v35 = vld [vmem:[%s2293_s2 + $0x10] sm:$0xff]  ;;  %v214_v36 = vld [vmem:[%s2293_s2 + $0x18] sm:$0xff]  ;;  %v216_v40 = vld [vmem:[%s2293_s2 + $0x28] sm:$0xff] }
  0x21   : > { %v178_v55 = vsel %vm155_vm0, %v150_v43, 0.0  ;;  %v180_v56 = vsel %vm155_vm0, %v152_v38, 0.0  ;;  %v182_v62 = vsel %vm155_vm0, %v154_v39, 0.0  ;;  %1470 = vmatprep.subr.bf16.mxu1 %v1469_v63  ;;  %1566 = vmatprep.subr.bf16.mxu0 %v1565_v4  ;;  %v1577_v24 = vpack.c.bf16 %v1024_v20, %v1023_v19  ;;  %v1027_v37 = vld [vmem:[%s2293_s2 + $0x210] sm:$0xff]  ;;  %v1028_v38 = vld [vmem:[%s2293_s2 + $0x218] sm:$0xff]  ;;  %v215_v39 = vld [vmem:[%s2293_s2 + $0x20] sm:$0xff] }
  0x22   : > { %189 = vrot.lane.b32.xlu0 %v162_v49, %s1806_s5  ;;  %v176_v59 = vadd.f32 %v175_v42, %v174_v50  ;;  %v169_v60 = vmax.f32 %v166_v51, %v168_v52  ;;  %v179_v61 = vadd.f32 %v178_v55, %v177_v48  ;;  %v1485_v27 = vpack.c.bf16 %v212_v23, %v211_v22  ;;  %v1029_v41 = vld [vmem:[%s2293_s2 + $0x220] sm:$0xff]  ;;  %v1030_v42 = vld [vmem:[%s2293_s2 + $0x228] sm:$0xff]  ;;  %v217_v51 = vld [vmem:[%s2293_s2 + $0x30] sm:$0xff] }
  0x23   : > { %1472 = vmatpush3.bf16.msra.mxu1 %v1469_v63  ;;  %v1581_v28 = vpack.c.bf16 %v1026_v26, %v1025_v25  ;;  %v1489_v46 = vpack.c.bf16 %v214_v36, %v213_v35  ;;  %v1585_v47 = vpack.c.bf16 %v1028_v38, %v1027_v37  ;;  %v1493_v49 = vpack.c.bf16 %v216_v40, %v215_v39  ;;  %v218_v52 = vld [vmem:[%s2293_s2 + $0x38] sm:$0xff]  ;;  %v221_v63 = vld [vmem:[%s2293_s2 + $0x50] sm:$0xff]  ;;  %v223_v5 = vld [vmem:[%s2293_s2 + $0x60] sm:$0xff] }
  0x24   : > { %v185_v2 = vmul.f32 0.25, %v176_v59  ;;  %v181_v3 = vadd.f32 %v180_v56, %v179_v61  ;;  %1474 = vmatprep.subr.bf16.mxu1 %v1473_v8  ;;  %1568 = vmatpush3.bf16.msra.mxu0 %v1565_v4  ;;  %v1589_v50 = vpack.c.bf16 %v1030_v42, %v1029_v41  ;;  %v1497_v55 = vpack.c.bf16 %v218_v52, %v217_v51  ;;  %v1033_v59 = vld [vmem:[%s2293_s2 + $0x240] sm:$0xff]  ;;  %v1035_v1 = vld [vmem:[%s2293_s2 + $0x250] sm:$0xff]  ;;  %v224_v6 = vld [vmem:[%s2293_s2 + $0x68] sm:$0xff] }
  0x25   : > { %1570 = vmatprep.subr.bf16.mxu0 %v1569_v12  ;;  %v1593_v56 = vpack.c.bf16 %v1032_v54, %v1031_v53  ;;  %v1501_v61 = vpack.c.bf16 %v220_v58, %v219_v57  ;;  %v1509_v9 = vpack.c.bf16 %v224_v6, %v223_v5  ;;  %v1039_v13 = vld [vmem:[%s2293_s2 + $0x270] sm:$0xff]  ;;  %v1040_v14 = vld [vmem:[%s2293_s2 + $0x278] sm:$0xff]  ;;  %v993_v17 = vld [vmem:[%s2293_s2 + $0x100] sm:$0xff] }
  0x26   : > { %200 = vrot.lane.b32.xlu1 %v185_v2, %s1807_s10  ;;  %191 = vrot.lane.b32.xlu0 %v169_v60, %s1806_s5  ;;  %v183_v7 = vadd.f32 %v182_v62, %v181_v3  ;;  %v1034_v60 = vld [vmem:[%s2293_s2 + $0x248] sm:$0xff]  ;;  %v1036_v2 = vld [vmem:[%s2293_s2 + $0x258] sm:$0xff]  ;;  %v1505_v3 = vpack.c.bf16 %v222_v0, %v221_v63  ;;  %v1609_v16 = vpack.c.bf16 %v1040_v14, %v1039_v13  ;;  %s138_s5 = scalar_lea.vmem [#allocation5], %s974_s30 }
  0x27   : > { %1476 = vmatpush3.bf16.msra.mxu1 %v1473_v8  ;;  %v1597_v62 = vpack.c.bf16 %v1034_v60, %v1033_v59  ;;  %v1601_v4 = vpack.c.bf16 %v1036_v2, %v1035_v1  ;;  %v1038_v8 = vld [vmem:[%s2293_s2 + $0x268] sm:$0xff]  ;;  %v1041_v19 = vld [vmem:[%s2293_s2 + $0x280] sm:$0xff]  ;;  %v995_v23 = vld [vmem:[%s2293_s2 + $0x110] sm:$0xff]  ;;  %s908_s6 = sshll.u32 %s138_s5, 4  ;;  %s2246_s6 = int_to_ptr.vmem [resolvable:$true] %s908_s6 }
  0x28   : > { %v186_v11 = vmul.f32 0.25, %v183_v7  ;;  %1478 = vmatprep.subr.bf16.mxu1 %v1477_v15  ;;  %1572 = vmatpush3.bf16.msra.mxu0 %v1569_v12  ;;  %v1037_v7 = vld [vmem:[%s2293_s2 + $0x260] sm:$0xff]  ;;  %v226_v12 = vld [vmem:[%s2293_s2 + $0x78] sm:$0xff]  ;;  %v1042_v20 = vld [vmem:[%s2293_s2 + $0x288] sm:$0xff]  ;;  %s1741_s0 = scalar_lea.vmem %s2246_s6, 256  ;;  %p1748_p0 = scmp.lt.s32.totalorder %s2246_s6, %s1746_s13 }
  0x29   : > { %1574 = vmatprep.subr.bf16.mxu0 %v1573_v18  ;;  %v1605_v10 = vpack.c.bf16 %v1038_v8, %v1037_v7  ;;  %v1613_v22 = vpack.c.bf16 %v1042_v20, %v1041_v19  ;;  %v1043_v25 = vld [vmem:[%s2293_s2 + $0x290] sm:$0xff]  ;;  %v1044_v26 = vld [vmem:[%s2293_s2 + $0x298] sm:$0xff]  ;;  %v1046_v35 = vld [vmem:[%s2293_s2 + $0x2a8] sm:$0xff]  ;;  %p1742_p11 = scmp.ne.s32.totalorder %s2246_s6, %s1741_s0  ;;  %p1749_p1 = scmp.lt.s32.totalorder %s1747_s18, %s1741_s0 }
  0x2a   : > { %202 = vrot.lane.b32.xlu1 %v186_v11, %s1807_s10  ;;  %v225_v11 = vld [vmem:[%s2293_s2 + $0x70] sm:$0xff]  ;;  %v1000_v40 = vld [vmem:[%s2293_s2 + $0x138] sm:$0xff]  ;;  %v1005_v57 = vld [vmem:[%s2293_s2 + $0x160] sm:$0xff] }
  0x2b   : > { %1480 = vmatpush3.bf16.msra.mxu1 %v1477_v15  ;;  %v1513_v15 = vpack.c.bf16 %v226_v12, %v225_v11  ;;  %v999_v39 = vld [vmem:[%s2293_s2 + $0x130] sm:$0xff]  ;;  %v1048_v42 = vld [vmem:[%s2293_s2 + $0x2b8] sm:$0xff]  ;;  %v1006_v58 = vld [vmem:[%s2293_s2 + $0x168] sm:$0xff]  ;;  %p1743_p12 = pnand %p1742_p11, %p1872_p5  ;;  %p1750_p2 = por %p1749_p1, %p1748_p0 }
  0x2c   : > { %1482 = vmatprep.subr.bf16.mxu1 %v1481_v21  ;;  %1576 = vmatpush3.bf16.msra.mxu0 %v1573_v18  ;;  %v994_v18 = vld [vmem:[%s2293_s2 + $0x108] sm:$0xff]  ;;  %v1047_v41 = vld [vmem:[%s2293_s2 + $0x2b0] sm:$0xff]  ;;  %v1004_v52 = vld [vmem:[%s2293_s2 + $0x158] sm:$0xff] }
  0x2d   : > { %1578 = vmatprep.subr.bf16.mxu0 %v1577_v24  ;;  %v1003_v51 = vld [vmem:[%s2293_s2 + $0x150] sm:$0xff]  ;;  %v1052_v54 = vld [vmem:[%s2293_s2 + $0x2d8] sm:$0xff]  ;;  %v1053_v59 = vld [vmem:[%s2293_s2 + $0x2e0] sm:$0xff]  ;;  %p1744_p13 = pneg %p1743_p12 }
  0x2e   : > { %v1051_v53 = vld [vmem:[%s2293_s2 + $0x2d0] sm:$0xff]  ;;  %v1054_v60 = vld [vmem:[%s2293_s2 + $0x2e8] sm:$0xff]  ;;  %v1008_v0 = vld [vmem:[%s2293_s2 + $0x178] sm:$0xff] }
  0x2f   : > { %1484 = vmatpush3.bf16.msra.mxu1 %v1481_v21  ;;  %v1517_v21 = vpack.c.bf16 %v994_v18, %v993_v17  ;;  %v1007_v63 = vld [vmem:[%s2293_s2 + $0x170] sm:$0xff]  ;;  %v1056_v2 = vld [vmem:[%s2293_s2 + $0x2f8] sm:$0xff]  ;;  %v1057_v5 = vld [vmem:[%s2293_s2 + $0x300] sm:$0xff]  ;;  %p1751_p3 = pnand %p1750_p2, %p1744_p13 }
  0x30   : > { %1486 = vmatprep.subr.bf16.mxu1 %v1485_v27  ;;  %1580 = vmatpush3.bf16.msra.mxu0 %v1577_v24  ;;  %v996_v24 = vld [vmem:[%s2293_s2 + $0x118] sm:$0xff]  ;;  %v1055_v1 = vld [vmem:[%s2293_s2 + $0x2f0] sm:$0xff]  ;;  %v1058_v6 = vld [vmem:[%s2293_s2 + $0x308] sm:$0xff] }
  0x31   : > { %1582 = vmatprep.subr.bf16.mxu0 %v1581_v28  ;;  %v1645_v7 = vpack.c.bf16 %v1058_v6, %v1057_v5  ;;  %v1059_v8 = vld [vmem:[%s2293_s2 + $0x310] sm:$0xff]  ;;  %v1061_v13 = vld [vmem:[%s2293_s2 + $0x320] sm:$0xff]  ;;  %v1062_v14 = vld [vmem:[%s2293_s2 + $0x328] sm:$0xff] }
  0x32   : > { %v1063_v17 = vld [vmem:[%s2293_s2 + $0x330] sm:$0xff]  ;;  %v1064_v18 = vld [vmem:[%s2293_s2 + $0x338] sm:$0xff]  ;;  %v1065_v20 = vld [vmem:[%s2293_s2 + $0x340] sm:$0xff] }
  0x33   : > { %v1657_v19 = vpack.c.bf16 %v1064_v18, %v1063_v17 }
  0x94   : > { %v190_v29 = vpop.permute.xlu0 %189 }
  0x95   : > { %196 = vst.msk [vmem:[#allocation2 + $0x3] sm:$0xff] %vm195_vm1, %v190_v29 }
  0x98   : > { %v201_v30 = vpop.permute.xlu1 %200  ;;  %v192_v31 = vpop.permute.xlu0 %191 }
  0x99   : > { %207 = vst.msk [vmem:[#allocation2 + $0x3] sm:$0xff] %vm206_vm2, %v201_v30  ;;  %v1521_v30 = vpack.c.bf16 %v996_v24, %v995_v23  ;;  %v1067_v23 = vld [vmem:[%s2293_s2 + $0x350] sm:$0xff]  ;;  %v1068_v24 = vld [vmem:[%s2293_s2 + $0x358] sm:$0xff] }
  0x9a   : > { %197 = vst.msk [vmem:[#allocation2 + $0xb] sm:$0xff] %vm195_vm1, %v192_v31  ;;  %v1617_v31 = vpack.c.bf16 %v1044_v26, %v1043_v25  ;;  %v1665_v25 = vpack.c.bf16 %v1068_v24, %v1067_v23  ;;  %v1069_v26 = vld [vmem:[%s2293_s2 + $0x360] sm:$0xff] }
  0x9c   : > { %v203_v32 = vpop.permute.xlu1 %202 }
  0x9d   : > { %208 = vst.msk [vmem:[#allocation2 + $0xb] sm:$0xff] %vm206_vm2, %v203_v32  ;;  %v998_v32 = vld [vmem:[%s2293_s2 + $0x128] sm:$0xff] }
  0xa0   : > { %v227_v33 = vld [vmem:[#allocation2 + $0x1] sm:$0xff] }
  0xa1   : > { %v492_v34 = vld [vmem:[#allocation2 + $0x3] sm:$0xff]  ;;  %1240 = vmatprep.mubr.f32.mxu1 %v227_v33 }
  0xa2   : > { %1345 = vmatprep.mubr.f32.mxu0 %v492_v34  ;;  %v209_v48 = vld [vmem:[#allocation2] sm:$0xff] }
  0xa3   : > { %v396_v33 = vld [vmem:[#allocation2 + $0x2] sm:$0xff] }
  0xa4   : > { %v228_v43 = vld [vmem:[#allocation2 + $0x9] sm:$0xff]  ;;  %v1045_v34 = vld [vmem:[%s2293_s2 + $0x2a0] sm:$0xff] }
  0xa5   : > { %v493_v44 = vld [vmem:[#allocation2 + $0xb] sm:$0xff]  ;;  %1241 = vmatmul.mubr.f32.vlgmr.msra.gmra.mrb[0].mxu1 %v228_v43  ;;  %v1621_v38 = vpack.c.bf16 %v1046_v35, %v1045_v34  ;;  %v1529_v43 = vpack.c.bf16 %v1000_v40, %v999_v39 }
  0xa6   : > { %v588_v45 = vld [vmem:[#allocation2 + $0x4] sm:$0xff]  ;;  %1346 = vmatmul.mubr.f32.vlgmr.msra.gmra.mrb[0].mxu0 %v493_v44  ;;  %1488 = vmatpush3.bf16.msra.mxu1 %v1485_v27  ;;  %v589_v29 = vld [vmem:[#allocation2 + $0xc] sm:$0xff]  ;;  %v1625_v44 = vpack.c.bf16 %v1048_v42, %v1047_v41 }
  0xa7   : > { %1584 = vmatpush3.bf16.msra.mxu0 %v1581_v28  ;;  %1275 = vmatprep.mubr.f32.mxu1 %v209_v48  ;;  %v997_v27 = vld [vmem:[%s2293_s2 + $0x120] sm:$0xff]  ;;  %v210_v28 = vld [vmem:[#allocation2 + $0x8] sm:$0xff] }
  0xa8   : > { %1380 = vmatprep.mubr.f32.mxu0 %v588_v45  ;;  %1490 = vmatprep.subr.bf16.mxu1 %v1489_v46  ;;  %v684_v36 = vld [vmem:[#allocation2 + $0x5] sm:$0xff]  ;;  %v1525_v37 = vpack.c.bf16 %v998_v32, %v997_v27  ;;  %v685_v12 = vld [vmem:[#allocation2 + $0xd] sm:$0xff] }
  0xa9   : > { %1586 = vmatprep.subr.bf16.mxu0 %v1585_v47  ;;  %v1001_v45 = vld [vmem:[%s2293_s2 + $0x140] sm:$0xff]  ;;  %v1050_v48 = vld [vmem:[%s2293_s2 + $0x2c8] sm:$0xff] }
  0xaa   : > { %1492 = vmatpush3.bf16.msra.mxu1 %v1489_v46  ;;  %v1002_v46 = vld [vmem:[%s2293_s2 + $0x148] sm:$0xff] }
  0xab   : > { %1588 = vmatpush3.bf16.msra.mxu0 %v1585_v47  ;;  %1494 = vmatprep.subr.bf16.mxu1 %v1493_v49  ;;  %v1049_v47 = vld [vmem:[%s2293_s2 + $0x2c0] sm:$0xff]  ;;  %v1070_v27 = vld [vmem:[%s2293_s2 + $0x368] sm:$0xff] }
  0xac   : > { %1590 = vmatprep.subr.bf16.mxu0 %v1589_v50  ;;  %v781_v32 = vld [vmem:[#allocation2 + $0xe] sm:$0xff] }
  0xae   : > { %1496 = vmatpush3.bf16.msra.mxu1 %v1493_v49  ;;  %v1533_v49 = vpack.c.bf16 %v1002_v46, %v1001_v45 }
  0xaf   : > { %1592 = vmatpush3.bf16.msra.mxu0 %v1589_v50  ;;  %1498 = vmatprep.subr.bf16.mxu1 %v1497_v55  ;;  %v1629_v50 = vpack.c.bf16 %v1050_v48, %v1049_v47 }
  0xb0   : > { %1594 = vmatprep.subr.bf16.mxu0 %v1593_v56 }
  0xb2   : > { %1500 = vmatpush3.bf16.msra.mxu1 %v1497_v55  ;;  %v1537_v55 = vpack.c.bf16 %v1004_v52, %v1003_v51 }
  0xb3   : > { %1596 = vmatpush3.bf16.msra.mxu0 %v1593_v56  ;;  %1502 = vmatprep.subr.bf16.mxu1 %v1501_v61  ;;  %v1633_v56 = vpack.c.bf16 %v1052_v54, %v1051_v53 }
  0xb4   : > { %1598 = vmatprep.subr.bf16.mxu0 %v1597_v62 }
  0xb6   : > { %1504 = vmatpush3.bf16.msra.mxu1 %v1501_v61  ;;  %v1541_v61 = vpack.c.bf16 %v1006_v58, %v1005_v57 }
  0xb7   : > { %1600 = vmatpush3.bf16.msra.mxu0 %v1597_v62  ;;  %1506 = vmatprep.subr.bf16.mxu1 %v1505_v3  ;;  %v1637_v62 = vpack.c.bf16 %v1054_v60, %v1053_v59 }
  0xb8   : > { %1602 = vmatprep.subr.bf16.mxu0 %v1601_v4 }
  0xba   : > { %1508 = vmatpush3.bf16.msra.mxu1 %v1505_v3  ;;  %v1545_v3 = vpack.c.bf16 %v1008_v0, %v1007_v63 }
  0xbb   : > { %1604 = vmatpush3.bf16.msra.mxu0 %v1601_v4  ;;  %1510 = vmatprep.subr.bf16.mxu1 %v1509_v9  ;;  %v1641_v4 = vpack.c.bf16 %v1056_v2, %v1055_v1 }
  0xbc   : > { %1606 = vmatprep.subr.bf16.mxu0 %v1605_v10 }
  0xbe   : > { %1512 = vmatpush3.bf16.msra.mxu1 %v1509_v9  ;;  %v1060_v9 = vld [vmem:[%s2293_s2 + $0x318] sm:$0xff] }
  0xbf   : > { %1608 = vmatpush3.bf16.msra.mxu0 %v1605_v10  ;;  %1514 = vmatprep.subr.bf16.mxu1 %v1513_v15  ;;  %v397_v10 = vld [vmem:[#allocation2 + $0xa] sm:$0xff]  ;;  %v1649_v11 = vpack.c.bf16 %v1060_v9, %v1059_v8 }
  0xc0   : > { %1610 = vmatprep.subr.bf16.mxu0 %v1609_v16 }
  0xc2   : > { %1516 = vmatpush3.bf16.msra.mxu1 %v1513_v15  ;;  %v780_v15 = vld [vmem:[#allocation2 + $0x6] sm:$0xff] }
  0xc3   : > { %1612 = vmatpush3.bf16.msra.mxu0 %v1609_v16  ;;  %1518 = vmatprep.subr.bf16.mxu1 %v1517_v21  ;;  %v1653_v16 = vpack.c.bf16 %v1062_v14, %v1061_v13 }
  0xc4   : > { %1614 = vmatprep.subr.bf16.mxu0 %v1613_v22 }
  0xc5   : > { %1276 = vmatmul.mubr.f32.vlgmr.msra.gmra.mrb[0].mxu1 %v210_v28  ;;  %v1669_v28 = vpack.c.bf16 %v1070_v27, %v1069_v26 }
  0xc6   : > { %1381 = vmatmul.mubr.f32.vlgmr.msra.gmra.mrb[0].mxu0 %v589_v29  ;;  %1520 = vmatpush3.bf16.msra.mxu1 %v1517_v21  ;;  %v1066_v21 = vld [vmem:[%s2293_s2 + $0x348] sm:$0xff]  ;;  %v1071_v29 = vld [vmem:[%s2293_s2 + $0x370] sm:$0xff] }
  0xc7   : > { %1310 = vmatprep.mubr.f32.mxu1 %v396_v33  ;;  %1616 = vmatpush3.bf16.msra.mxu0 %v1613_v22  ;;  %v1661_v22 = vpack.c.bf16 %v1066_v21, %v1065_v20 }
  0xc8   : > { %1415 = vmatprep.mubr.f32.mxu0 %v684_v36  ;;  %1522 = vmatprep.subr.bf16.mxu1 %v1521_v30  ;;  %v877_v36 = vstv %s876_s28 }
  0xc9   : > { %1618 = vmatprep.subr.bf16.mxu0 %v1617_v31 }
  0xca   : > { %1524 = vmatpush3.bf16.msra.mxu1 %v1521_v30  ;;  %v1072_v30 = vld [vmem:[%s2293_s2 + $0x378] sm:$0xff] }
  0xcb   : > { %1620 = vmatpush3.bf16.msra.mxu0 %v1617_v31  ;;  %1526 = vmatprep.subr.bf16.mxu1 %v1525_v37  ;;  %v1673_v31 = vpack.c.bf16 %v1072_v30, %v1071_v29 }
  0xcc   : > { %1622 = vmatprep.subr.bf16.mxu0 %v1621_v38 }
  0xce   : > { %1528 = vmatpush3.bf16.msra.mxu1 %v1525_v37 }
  0xcf   : > { %1624 = vmatpush3.bf16.msra.mxu0 %v1621_v38  ;;  %1530 = vmatprep.subr.bf16.mxu1 %v1529_v43 }
  0xd0   : > { %1626 = vmatprep.subr.bf16.mxu0 %v1625_v44 }
  0xd2   : > { %1532 = vmatpush3.bf16.msra.mxu1 %v1529_v43 }
  0xd3   : > { %1628 = vmatpush3.bf16.msra.mxu0 %v1625_v44  ;;  %1534 = vmatprep.subr.bf16.mxu1 %v1533_v49 }
  0xd4   : > { %1630 = vmatprep.subr.bf16.mxu0 %v1629_v50 }
  0xd6   : > { %1536 = vmatpush3.bf16.msra.mxu1 %v1533_v49 }
  0xd7   : > { %1632 = vmatpush3.bf16.msra.mxu0 %v1629_v50  ;;  %1538 = vmatprep.subr.bf16.mxu1 %v1537_v55 }
  0xd8   : > { %1634 = vmatprep.subr.bf16.mxu0 %v1633_v56 }
  0xda   : > { %1540 = vmatpush3.bf16.msra.mxu1 %v1537_v55 }
  0xdb   : > { %1636 = vmatpush3.bf16.msra.mxu0 %v1633_v56  ;;  %1542 = vmatprep.subr.bf16.mxu1 %v1541_v61 }
  0xdc   : > { %1638 = vmatprep.subr.bf16.mxu0 %v1637_v62 }
  0xde   : > { %1544 = vmatpush3.bf16.msra.mxu1 %v1541_v61 }
  0xdf   : > { %1640 = vmatpush3.bf16.msra.mxu0 %v1637_v62  ;;  %1546 = vmatprep.subr.bf16.mxu1 %v1545_v3 }
  0xe0   : > { %1642 = vmatprep.subr.bf16.mxu0 %v1641_v4 }
  0xe2   : > { %1548 = vmatpush3.bf16.msra.mxu1 %v1545_v3 }
  0xe3   : > { %1644 = vmatpush3.bf16.msra.mxu0 %v1641_v4 }
  0xe4   : > { %1646 = vmatprep.subr.bf16.mxu0 %v1645_v7 }
  0xe5   : > { %1311 = vmatmul.mubr.f32.vlgmr.msra.gmra.mrb[0].mxu1 %v397_v10 }
  0xe6   : > { %1416 = vmatmul.mubr.f32.vlgmr.msra.gmra.mrb[0].mxu0 %v685_v12 }
  0xe7   : > { %1648 = vmatpush3.bf16.msra.mxu0 %v1645_v7  ;;  %1450 = vmatprep.mubr.f32.mxu0 %v780_v15 }
  0xe8   : > { %1650 = vmatprep.subr.bf16.mxu0 %v1649_v11 }
  0xeb   : > { %1652 = vmatpush3.bf16.msra.mxu0 %v1649_v11 }
  0xec   : > { %1654 = vmatprep.subr.bf16.mxu0 %v1653_v16 }
  0xef   : > { %1656 = vmatpush3.bf16.msra.mxu0 %v1653_v16 }
  0xf0   : > { %1658 = vmatprep.subr.bf16.mxu0 %v1657_v19 }
  0xf3   : > { %1660 = vmatpush3.bf16.msra.mxu0 %v1657_v19 }
  0xf4   : > { %1662 = vmatprep.subr.bf16.mxu0 %v1661_v22 }
  0xf7   : > { %1664 = vmatpush3.bf16.msra.mxu0 %v1661_v22 }
  0xf8   : > { %1666 = vmatprep.subr.bf16.mxu0 %v1665_v25 }
  0xfb   : > { %1668 = vmatpush3.bf16.msra.mxu0 %v1665_v25 }
  0xfc   : > { %1670 = vmatprep.subr.bf16.mxu0 %v1669_v28 }
  0xff   : > { %1672 = vmatpush3.bf16.msra.mxu0 %v1669_v28 }
 0x100   : > { %1674 = vmatprep.subr.bf16.mxu0 %v1673_v31 }
 0x103   : > { %1676 = vmatpush3.bf16.msra.mxu0 %v1673_v31 }
 0x106   : > { %1451 = vmatmul.mubr.f32.vlgmr.msra.gmra.mrb[0].mxu0 %v781_v32 }
 0x1b8   : > { %v1312_v33 = vpop.f32.mrb[0].mxu1 }
 0x1b9   : > { %v481_v34 = vpop.f32.mrb[1].mxu1 }
 0x1d9   : > { %v1452_v35 = vpop.f32.mrb[0].mxu0 }
 0x1da   : > { %v1677_v37 = vadd.f32 %v1452_v35, %v1312_v33  ;;  %v865_v38 = vpop.f32.mrb[1].mxu0 }
 0x1db   : > { %v1678_v39 = vadd.f32 %v865_v38, %v481_v34 }
 0x1dc   : > { %v879_v40 = vadd.f32 %v1677_v37, %v877_v36 }
 0x1dd   : > { %v878_v41 = vadd.f32 %v1678_v39, %v877_v36 }
 0x1de   : > { %v1074_v42 = vmul.f32 -1.442695, %v879_v40 }
 0x1df   : > { %v1073_v43 = vmul.f32 -1.442695, %v878_v41 }
 0x1e0   : > { %1733 = vpow2.f32 %v1074_v42 }
 0x1e1   : > { %1735 = vpow2.f32 %v1073_v43 }
 0x1ea   : > { %v1734_v44 = vpop.eup %1733 }
 0x1eb   : > { %v1736_v45 = vpop.eup %1735  ;;  %v887_v46 = vadd.f32 1.0, %v1734_v44 }
 0x1ec   : > { %v886_v47 = vadd.f32 1.0, %v1736_v45 }
 0x1ed   : > { %1737 = vrcp.f32 %v887_v46 }
 0x1ee   : > { %1739 = vrcp.f32 %v886_v47 }
 0x1f7   : > { %v1738_v48 = vpop.eup %1737 }
 0x1f8   : > { %v1740_v49 = vpop.eup %1739  ;;  %893 = vst.msk [vmem:[%s138_s5 + $0x8] sm:$0xff] %vm155_vm0, %v1738_v48 }
 0x1f9   : > { %892 = vst.msk [vmem:[%s138_s5] sm:$0xff] %vm155_vm0, %v1740_v49 }
 0x1fa   : > { %1754 = shalt.err (!%p1751_p3)
}
 0x1fb   : > { %s1755_s10 = scalar_lea.hbm %s2244_s9, 256  ;;  %s1759_s25 = scalar_lea.hbm %s2294_s3, 512 }
 0x1fc   : > { %p1756_p4 = scmp.ne.s32.totalorder %s2244_s9, %s1755_s10  ;;  %p1760_p9 = scmp.lt.u32.totalorder %s2244_s9, %s2294_s3 }
 0x1fd   : > { %p1761_p10 = scmp.lt.u32.totalorder %s1759_s25, %s1755_s10  ;;  %p1763_p12 = scmp.lt.u32.totalorder %s1755_s10, %s2244_s9 }
 0x1fe   : > { %p1757_p7 = pnand %p1756_p4, %p1872_p5 }
 0x1ff   : > { %p1762_p11 = por %p1761_p10, %p1760_p9 }
 0x200   : > { %p1758_p8 = pneg %p1757_p7 }
 0x201   : > { %p1764_p13 = por %p1763_p12, %p1762_p11 }
 0x203   : > { %p1765_p0 = pnand %p1764_p13, %p1758_p8 }
 0x205   : > { %1768 = shalt.err (!%p1765_p0)
}
 0x206   : > { %s1809_s28 = smov 128   ;;  %s1810_s29 = smov 8  }
 0x207   : > { %1689 = dma.vmem_to_hbm [thread:$0]  (%p1872_p5), %s2246_s6, 256, %s2244_s9, %s2250_s11, %s1809_s28, %s1809_s28, %s1810_s29  }
 0x208 PF: > { %p1695_p1 = scmp.ge.s32.totalorder %s1803_s17, 2  ;;  %s923_s30 = sand.u32 1, %s1791_s14  }
 0x209   : > { %s924_s4 = scalar_lea.sflag [#allocation6], %s923_s30 }
 0x20a   : > { %p1692_p2 = pnand %p1695_p1, %p1876_p6 }
 0x20c   : > { %1786 = dma.done.wait (!%p1692_p2), %s924_s4, 256  }
 0x20d   : > { %1788 = vsyncadd (!%p1692_p2), %s924_s4, 4294967040  ;;  %p14_p3 = scmp.ge.s32.totalorder %s1859_s19, 4   ;;  %s2297_s14 = smov %s1795_s15 }
 0x20e   : > { %s2298_s15 = smov %s1799_s16  ;;  %s2299_s16 = smov %s1870_s22 }
 0x20f   : > { %s2300_s17 = smov %s1859_s19  ;;  %16 = sbr.rel (!%p14_p3) target bundleno = 5 (0x5), region = 69 }
 0x216   :  { %929 = vsyncpa [#allocation6], 1 }
 0x217   :  { %931 = vsyncpa [#allocation6 + $0x1], 1 }

</bundles_post_ra>
